<compile_context>
chip_gen: v6e
topology: v6e:2x2x1
jax: 0.10.0
libtpu: 0.0.40
codegen_flags: <defaults>
</compile_context>

<pallas_src>
import math

import jax
import jax.numpy as jnp
from jax.experimental import pallas as pl
from jax.experimental.pallas import tpu as pltpu


# ----------------------------------------------------------------------------
# Pallas kernel: T fused GRU decode steps (grid over steps, weights resident).
# ----------------------------------------------------------------------------
def decode_rnn_kernel(tok_ref, emb_ref, h0_ref, w_ref, b_ref, h_ref):
    # tok_ref : SMEM (T,)       int32    -- scalar-prefetched token ids
    # emb_ref : VMEM (V, H)     float32  -- embedding table (resident, loaded once)
    # h0_ref  : VMEM (1, H)     float32  -- initial hidden state
    # w_ref   : VMEM (2H, 4L)   bfloat16 -- fused [x;h] -> [r_sum|z_sum|n_i|n_h] weight
    # b_ref   : VMEM (1, 4L)    float32  -- [b_ir+b_hr | b_iz+b_hz | b_in | b_hn]
    # h_ref   : VMEM (1, H)     float32  -- output block, constant index => acts
    #                                       as the carried hidden state
    t = pl.program_id(0)
    H = h0_ref.shape[-1]
    L = b_ref.shape[-1] // 4          # lane-padded per-gate width (multiple of 128)

    @pl.when(t == 0)
    def _():
        h_ref[...] = h0_ref[...]

    h = h_ref[...]                                        # (1, H) f32 carried state

    # Gather this step's embedding row from the VMEM-resident table.
    tok = tok_ref[t]
    x = emb_ref[pl.ds(tok, 1), :]                         # (1, H) f32

    # Single fused MXU push: [x | h] @ W_cat, f32 accumulation.
    xh = jnp.concatenate([x, h], axis=-1).astype(jnp.bfloat16)   # (1, 2H) bf16
    g = jnp.dot(xh, w_ref[...], preferred_element_type=jnp.float32) + b_ref[...]

    # Gate blocks sit at 128-lane boundaries -> lane-0-aligned slices, no rotates.
    r = jax.nn.sigmoid(g[:, 0:H])                         # sigma(W_ir x + W_hr h + b)
    z = jax.nn.sigmoid(g[:, L:L + H])                     # sigma(W_iz x + W_hz h + b)
    n = jnp.tanh(g[:, 2 * L:2 * L + H] +
                 r * g[:, 3 * L:3 * L + H])               # tanh(gi_n + r*(gh_n))

    h_ref[...] = (1.0 - z) * n + z * h                    # new hidden, stays resident


# ----------------------------------------------------------------------------
# Wrappers.
# ----------------------------------------------------------------------------
def decode_rnn_steps(tokens, hidden0, params):
    """Run T decode steps in ONE pallas_call. Returns (per-step outputs, final h)."""
    H = params["hidden_size"]
    L = params["gate_lane"]
    emb = params["emb"]
    V = emb.shape[0]

    tokens = jnp.asarray(tokens, jnp.int32).reshape(-1)
    T = int(tokens.shape[0])
    h0 = jnp.asarray(hidden0, jnp.float32).reshape(1, H)

    grid_spec = pltpu.PrefetchScalarGridSpec(
        num_scalar_prefetch=1,                 # token ids -> SMEM, visible to index_maps
        grid=(T,),
        in_specs=[
            pl.BlockSpec((V, H), lambda t, tok: (0, 0)),          # emb table (resident)
            pl.BlockSpec((1, H), lambda t, tok: (0, 0)),          # h0
            pl.BlockSpec((2 * H, 4 * L), lambda t, tok: (0, 0)),  # fused weight (resident)
            pl.BlockSpec((1, 4 * L), lambda t, tok: (0, 0)),      # packed bias  (resident)
        ],
        out_specs=pl.BlockSpec((1, H), lambda t, tok: (0, 0)),    # hidden carry
    )

    h_final = pl.pallas_call(
        decode_rnn_kernel,
        out_shape=jax.ShapeDtypeStruct((1, H), jnp.float32),
        grid_spec=grid_spec,
        compiler_params=pltpu.CompilerParams(
            dimension_semantics=("arbitrary",)),   # step axis carries state
    )(tokens, emb, h0, params["w_cat"], params["b_all"])

    # F.log_softmax(output, dim=1): dim=1 has size 1 -> identically zero; emit
    # wrapper-side instead of computing/DMA-ing it in-kernel.
    outputs = jnp.zeros((T, 1, 1, H), jnp.float32)
    return outputs, h_final.reshape(1, 1, H)


def decode_rnn_forward(x_tok, hidden, params):
    """Single DecodeRNN.forward step (matches the PyTorch module signature)."""
    outputs, h_new = decode_rnn_steps(
        jnp.reshape(jnp.asarray(x_tok, jnp.int32), (1,)), hidden, params)
    return outputs[0], h_new


# ----------------------------------------------------------------------------
# Deterministic parameter construction (mirrors nn.Embedding / nn.GRU init).
# ----------------------------------------------------------------------------
def make_params(key, hidden, output_vocab):
    H, V = hidden, output_vocab
    L = ((H + 127) // 128) * 128        # lane-padded per-gate width (>= 128)
    k_emb, k_wi, k_wh, k_bi, k_bh, k_fcw, k_fcb = jax.random.split(key, 7)
    bound = 1.0 / math.sqrt(H)

    # nn.Embedding: N(0, 1)
    emb = jax.random.normal(k_emb, (V, H), jnp.float32)

    # nn.GRU: U(-1/sqrt(H), 1/sqrt(H)); PyTorch gate order (r, z, n).
    w_ih = jax.random.uniform(k_wi, (3 * H, H), jnp.float32, -bound, bound)
    w_hh = jax.random.uniform(k_wh, (3 * H, H), jnp.float32, -bound, bound)
    b_ih = jax.random.uniform(k_bi, (3 * H,), jnp.float32, -bound, bound)
    b_hh = jax.random.uniform(k_bh, (3 * H,), jnp.float32, -bound, bound)

    # Quantize GRU weights to bf16 (MXU-native); the reference uses the same values.
    w_ih_q = w_ih.astype(jnp.bfloat16).astype(jnp.float32)
    w_hh_q = w_hh.astype(jnp.bfloat16).astype(jnp.float32)
    Wir, Wiz, Win = w_ih_q[0:H], w_ih_q[H:2 * H], w_ih_q[2 * H:3 * H]
    Whr, Whz, Whn = w_hh_q[0:H], w_hh_q[H:2 * H], w_hh_q[2 * H:3 * H]

    # Fused lane-padded weight: rows 0..H-1 multiply x, rows H..2H-1 multiply h;
    # gate g lives in lanes [g*L, g*L+H).  Column layout: [r_sum|z_sum|n_i|n_h].
    w_cat = jnp.zeros((2 * H, 4 * L), jnp.float32)
    w_cat = w_cat.at[0:H,     0 * L:0 * L + H].set(Wir.T)
    w_cat = w_cat.at[H:2 * H, 0 * L:0 * L + H].set(Whr.T)
    w_cat = w_cat.at[0:H,     1 * L:1 * L + H].set(Wiz.T)
    w_cat = w_cat.at[H:2 * H, 1 * L:1 * L + H].set(Whz.T)
    w_cat = w_cat.at[0:H,     2 * L:2 * L + H].set(Win.T)
    w_cat = w_cat.at[H:2 * H, 3 * L:3 * L + H].set(Whn.T)
    w_cat = w_cat.astype(jnp.bfloat16)

    # Packed bias in the same lane layout: [b_ir+b_hr | b_iz+b_hz | b_in | b_hn].
    b_all = jnp.zeros((1, 4 * L), jnp.float32)
    b_all = b_all.at[0, 0:H].set(b_ih[0:H] + b_hh[0:H])
    b_all = b_all.at[0, L:L + H].set(b_ih[H:2 * H] + b_hh[H:2 * H])
    b_all = b_all.at[0, 2 * L:2 * L + H].set(b_ih[2 * H:3 * H])
    b_all = b_all.at[0, 3 * L:3 * L + H].set(b_hh[2 * H:3 * H])

    # TODO(synk): fc Linear(hidden, output) is defined in __init__ but never
    # called in DecodeRNN.forward; initialized for shape fidelity only.
    fc_w = jax.random.uniform(k_fcw, (V, H), jnp.float32, -bound, bound)
    fc_b = jax.random.uniform(k_fcb, (V,), jnp.float32, -bound, bound)

    return {
        "hidden_size": H, "gate_lane": L,
        "emb": emb, "w_cat": w_cat, "b_all": b_all,
        "fc_w": fc_w, "fc_b": fc_b,
        # raw (bf16-quantized) copies for the reference check
        "_w_ih": w_ih_q, "_w_hh": w_hh_q, "_b_ih": b_ih, "_b_hh": b_hh,
    }


# ----------------------------------------------------------------------------
# Pure-JAX reference (mirrors the kernel's bf16-input / f32-accumulate policy).
# ----------------------------------------------------------------------------
def decode_rnn_reference_steps(tokens, hidden0, params):
    H = params["hidden_size"]
    h = jnp.asarray(hidden0, jnp.float32).reshape(1, H)
    w_ih, w_hh = params["_w_ih"], params["_w_hh"]
    b_ih, b_hh = params["_b_ih"], params["_b_hh"]
    outs = []
    for tok in list(jnp.asarray(tokens, jnp.int32).reshape(-1)):
        x = params["emb"][tok].reshape(1, H)
        xq = x.astype(jnp.bfloat16).astype(jnp.float32)
        hq = h.astype(jnp.bfloat16).astype(jnp.float32)
        gi = xq @ w_ih.T + b_ih
        gh = hq @ w_hh.T + b_hh
        r = jax.nn.sigmoid(gi[:, 0:H] + gh[:, 0:H])
        z = jax.nn.sigmoid(gi[:, H:2 * H] + gh[:, H:2 * H])
        n = jnp.tanh(gi[:, 2 * H:] + r * gh[:, 2 * H:])
        h = (1.0 - z) * n + z * h
        gru_out = h.reshape(1, 1, H)
        outs.append(jax.nn.log_softmax(gru_out, axis=1))   # size-1 axis -> zeros
    return jnp.stack(outs), h.reshape(1, 1, H)


if __name__ == "__main__":
    HIDDEN = 32     # hidden size
    OUTPUT = 16     # output vocabulary size
    T = 8           # fused decode steps in one pallas_call

    key = jax.random.PRNGKey(0)
    params = make_params(key, HIDDEN, OUTPUT)

    tokens = jax.random.randint(jax.random.fold_in(key, 123), (T,), 0, OUTPUT,
                                dtype=jnp.int32)
    hidden0 = jnp.zeros((1, 1, HIDDEN), jnp.float32)     # initHidden()

    # Fused T-step decode: one pallas_call, weights resident, h carried in VMEM.
    outs, h_T = decode_rnn_steps(tokens, hidden0, params)
    outs = jax.block_until_ready(outs)
    h_T = jax.block_until_ready(h_T)

    ref_outs, ref_h_T = decode_rnn_reference_steps(tokens, hidden0, params)
    assert outs.shape == (T, 1, 1, HIDDEN) and h_T.shape == (1, 1, HIDDEN)
    assert jnp.allclose(outs, ref_outs, atol=1e-5), "output mismatch (multi-step)"
    assert jnp.allclose(h_T, ref_h_T, atol=1e-3), "hidden mismatch (multi-step)"

    # Single-step forward (exactly the PyTorch DecodeRNN.forward contract).
    out1, h1 = decode_rnn_forward(tokens[0], hidden0, params)
    out1 = jax.block_until_ready(out1)
    h1 = jax.block_until_ready(h1)
    ref_out1, ref_h1 = decode_rnn_reference_steps(tokens[:1], hidden0, params)
    assert out1.shape == (1, 1, HIDDEN) and h1.shape == (1, 1, HIDDEN)
    assert jnp.allclose(out1, ref_out1[0], atol=1e-5), "output mismatch (single step)"
    assert jnp.allclose(h1, ref_h1, atol=1e-3), "hidden mismatch (single step)"

    print("KERNEL_OK")
</pallas_src>

<mosaic_0001>
module attributes {stable_mosaic.version = 11 : i64} {
  func.func @decode_rnn_kernel(%arg0: i32, %arg1: memref<8xi32, #tpu.memory_space<smem>>, %arg2: memref<16x32xf32, #tpu.memory_space<vmem>>, %arg3: memref<1x32xf32, #tpu.memory_space<vmem>>, %arg4: memref<64x512xbf16, #tpu.memory_space<vmem>>, %arg5: memref<1x512xf32, #tpu.memory_space<vmem>>, %arg6: memref<1x32xf32, #tpu.memory_space<vmem>>) attributes {dimension_semantics = [#tpu.dimension_semantics<arbitrary>], iteration_bounds = array<i64: 8>, scalar_prefetch = 1 : i64, scratch_operands = 0 : i64, tpu.core_type = #tpu.core_type<tc>, window_params = [{pipeline_mode = #tpu.pipeline_mode<synchronous>, transform_indices = @transform_0, window_bounds = array<i64: 16, 32>}, {pipeline_mode = #tpu.pipeline_mode<synchronous>, transform_indices = @transform_1, window_bounds = array<i64: 1, 32>}, {pipeline_mode = #tpu.pipeline_mode<synchronous>, transform_indices = @transform_2, window_bounds = array<i64: 64, 512>}, {pipeline_mode = #tpu.pipeline_mode<synchronous>, transform_indices = @transform_3, window_bounds = array<i64: 1, 512>}, {pipeline_mode = #tpu.pipeline_mode<synchronous>, transform_indices = @transform_4, window_bounds = array<i64: 1, 32>}]} {
    %c0_i32 = arith.constant 0 : i32
    %0 = arith.cmpi eq, %arg0, %c0_i32 : i32
    %1 = arith.extui %0 : i1 to i32
    %c0_i32_0 = arith.constant 0 : i32
    %2 = arith.cmpi ne, %1, %c0_i32_0 : i32
    scf.if %2 {
      %c0_12 = arith.constant 0 : index
      %c0_13 = arith.constant 0 : index
      %37 = vector.load %arg3[%c0_12, %c0_13] : memref<1x32xf32, #tpu.memory_space<vmem>>, vector<1x32xf32>
      %c0_14 = arith.constant 0 : index
      %c0_15 = arith.constant 0 : index
      %38 = vector.load %arg6[%c0_14, %c0_15] : memref<1x32xf32, #tpu.memory_space<vmem>>, vector<1x32xf32>
      tpu.vector_store %arg6[%c0_14, %c0_15], %37 {strides = array<i32>} : memref<1x32xf32, #tpu.memory_space<vmem>>, vector<1x32xf32>,
    } else {
    }
    %c0 = arith.constant 0 : index
    %c0_1 = arith.constant 0 : index
    %3 = vector.load %arg6[%c0, %c0_1] : memref<1x32xf32, #tpu.memory_space<vmem>>, vector<1x32xf32>
    %4 = arith.index_cast %arg0 : i32 to index
    %5 = memref.load %arg1[%4] : memref<8xi32, #tpu.memory_space<smem>>
    %6 = arith.index_cast %5 : i32 to index
    %c0_2 = arith.constant 0 : index
    %7 = vector.load %arg2[%6, %c0_2] : memref<16x32xf32, #tpu.memory_space<vmem>>, vector<1x32xf32>
    %8 = tpu.concatenate %7, %3 in 1 : vector<1x32xf32>, vector<1x32xf32> -> vector<1x64xf32>
    %9 = arith.truncf %8 : vector<1x64xf32> to vector<1x64xbf16>
    %c0_3 = arith.constant 0 : index
    %c0_4 = arith.constant 0 : index
    %10 = vector.load %arg4[%c0_3, %c0_4] : memref<64x512xbf16, #tpu.memory_space<vmem>>, vector<64x512xbf16>
    %cst = arith.constant dense<0.000000e+00> : vector<1x512xf32>
    %11 = tpu.matmul %9, %10, %cst {dimension_numbers = #tpu.dot_dimension_numbers<[1], [0], [0], [1], [0, 0, 1, 1], [], []>} : vector<1x64xbf16>, vector<64x512xbf16>, vector<1x512xf32> -> vector<1x512xf32>
    %c0_5 = arith.constant 0 : index
    %c0_6 = arith.constant 0 : index
    %12 = vector.load %arg5[%c0_5, %c0_6] : memref<1x512xf32, #tpu.memory_space<vmem>>, vector<1x512xf32>
    %13 = arith.addf %11, %12 : vector<1x512xf32>
    %14 = vector.extract_strided_slice %13 {offsets = [0, 0], sizes = [1, 32], strides = [1, 1]} : vector<1x512xf32> to vector<1x32xf32>
    %15 = arith.negf %14 : vector<1x32xf32>
    %16 = math.exp %15 : vector<1x32xf32>
    %cst_7 = arith.constant 1.000000e+00 : f32
    %17 = vector.broadcast %cst_7 : f32 to vector<1x32xf32>
    %18 = arith.addf %17, %16 : vector<1x32xf32>
    %19 = arith.divf %17, %18 : vector<1x32xf32>
    %20 = vector.extract_strided_slice %13 {offsets = [0, 128], sizes = [1, 32], strides = [1, 1]} : vector<1x512xf32> to vector<1x32xf32>
    %21 = arith.negf %20 : vector<1x32xf32>
    %22 = math.exp %21 : vector<1x32xf32>
    %cst_8 = arith.constant 1.000000e+00 : f32
    %23 = vector.broadcast %cst_8 : f32 to vector<1x32xf32>
    %24 = arith.addf %23, %22 : vector<1x32xf32>
    %25 = arith.divf %23, %24 : vector<1x32xf32>
    %26 = vector.extract_strided_slice %13 {offsets = [0, 256], sizes = [1, 32], strides = [1, 1]} : vector<1x512xf32> to vector<1x32xf32>
    %27 = vector.extract_strided_slice %13 {offsets = [0, 384], sizes = [1, 32], strides = [1, 1]} : vector<1x512xf32> to vector<1x32xf32>
    %28 = arith.mulf %19, %27 : vector<1x32xf32>
    %29 = arith.addf %26, %28 : vector<1x32xf32>
    %30 = math.tanh %29 : vector<1x32xf32>
    %cst_9 = arith.constant 1.000000e+00 : f32
    %31 = vector.broadcast %cst_9 : f32 to vector<1x32xf32>
    %32 = arith.subf %31, %25 : vector<1x32xf32>
    %33 = arith.mulf %32, %30 : vector<1x32xf32>
    %34 = arith.mulf %25, %3 : vector<1x32xf32>
    %35 = arith.addf %33, %34 : vector<1x32xf32>
    %c0_10 = arith.constant 0 : index
    %c0_11 = arith.constant 0 : index
    %36 = vector.load %arg6[%c0_10, %c0_11] : memref<1x32xf32, #tpu.memory_space<vmem>>, vector<1x32xf32>
    tpu.vector_store %arg6[%c0_10, %c0_11], %35 {strides = array<i32>} : memref<1x32xf32, #tpu.memory_space<vmem>>, vector<1x32xf32>,
    return
  }
  func.func @transform_0(%arg0: i32, %arg1: memref<8xi32, #tpu.memory_space<smem>>) -> (i32, i32) {
    %c0_i32 = arith.constant 0 : i32
    %c0_i32_0 = arith.constant 0 : i32
    %c0_i32_1 = arith.constant 0 : i32
    return %c0_i32, %c0_i32_0 : i32, i32
  }
  func.func @transform_1(%arg0: i32, %arg1: memref<8xi32, #tpu.memory_space<smem>>) -> (i32, i32) {
    %c0_i32 = arith.constant 0 : i32
    %c0_i32_0 = arith.constant 0 : i32
    %c0_i32_1 = arith.constant 0 : i32
    return %c0_i32, %c0_i32_0 : i32, i32
  }
  func.func @transform_2(%arg0: i32, %arg1: memref<8xi32, #tpu.memory_space<smem>>) -> (i32, i32) {
    %c0_i32 = arith.constant 0 : i32
    %c0_i32_0 = arith.constant 0 : i32
    %c0_i32_1 = arith.constant 0 : i32
    return %c0_i32, %c0_i32_0 : i32, i32
  }
  func.func @transform_3(%arg0: i32, %arg1: memref<8xi32, #tpu.memory_space<smem>>) -> (i32, i32) {
    %c0_i32 = arith.constant 0 : i32
    %c0_i32_0 = arith.constant 0 : i32
    %c0_i32_1 = arith.constant 0 : i32
    return %c0_i32, %c0_i32_0 : i32, i32
  }
  func.func @transform_4(%arg0: i32, %arg1: memref<8xi32, #tpu.memory_space<smem>>) -> (i32, i32) {
    %c0_i32 = arith.constant 0 : i32
    %c0_i32_0 = arith.constant 0 : i32
    %c0_i32_1 = arith.constant 0 : i32
    return %c0_i32, %c0_i32_0 : i32, i32
  }
}

</mosaic_0001>

<bundles_post_ra>
// kernel: tpu_custom_call.1
= control target key start
LH: loop header
LB: loop body
LE: loop exit
PB: predicated region body
PF: predicated region fallthrough
CT: control target
= control target key end

     0   :  { %s719_s18 = smov [#allocation3]   ;;  %s848_s0 = inlined_call_operand.hbm [shape: s32[8], index: 0, kind: input, shape index: {}]   ;;  %s849_s1 = inlined_call_operand.hbm [shape: f32[16,32], index: 1, kind: input, shape index: {}]   ;;  %s850_s2 = inlined_call_operand.vmem [shape: f32[1,32], index: 2, kind: input, shape index: {}]   ;;  %s851_s3 = inlined_call_operand.hbm [shape: bf16[64,512], index: 3, kind: input, shape index: {}]   ;;  %s852_s4 = inlined_call_operand.vmem [shape: f32[1,512], index: 4, kind: input, shape index: {}]   ;;  %s853_s5 = inlined_call_operand.hbm [shape: f32[1,32], index: 5, kind: output, shape index: {}]  }
   0x1   :  { %11 = dma.hbm_to_smem %s848_s0, 16, %s719_s18, [#allocation2] }
   0x2   :  { %701 = dma.done.wait [#allocation2], 16 }
   0x3   :  { %702 = vsyncadd [#allocation2], 4294967280 }
   0x4   :  { %13 = sfence }
   0x5   :  { %14 = vsyncpa [#allocation5], 0 }
   0x6   :  { %15 = vsyncpa [#allocation8], 0 }
   0x7   :  { %16 = vsyncpa [#allocation6], 0  ;;  %s762_s21 = smov 0  }
   0x8 LB: > { %s720_s22 = smov [#allocation4]   ;;  %s768_s24 = sadd.s32 4294967295, %s717_s21   ;;  %s717_s21 = sphi %s762_s21, %s22_s21  }
   0x9   : > { %s144_s23 = sshll.u32 %s720_s22, 4  ;;  %p505_p0 = scmp.ge.s32.totalorder %s717_s21, 1  ;;  %s145_s23 = int_to_ptr.vmem [resolvable:$true] %s144_s23 }
   0xa   : > { %p132_p1 = scmp.lt.s32.totalorder %s717_s21, 9  ;;  %p555_p4 = scmp.eq.s32.totalorder %s768_s24, 0 }
   0xb   : > { %s721_s25 = smov [#allocation7]   ;;  %s632_s28 = scalar_lea.vmem %s145_s23, 256 }
   0xc   : > { %p773_p3 = pnand %p505_p0, %p132_p1  ;;  %s160_s26 = sshll.u32 %s721_s25, 4  ;;  %s161_s26 = int_to_ptr.vmem [resolvable:$true] %s160_s26 }
   0xd   : > { %p633_p8 = scmp.ne.s32.totalorder %s145_s23, %s632_s28  ;;  %p640_p11 = scmp.lt.s32.totalorder %s145_s23, %s145_s23 }
   0xe   : > { %p548_p5 = pneg %p773_p3  ;;  %p641_p12 = scmp.lt.s32.totalorder %s632_s28, %s632_s28 }
  0x10   : > { %p782_p6 = pnand %p555_p4, %p548_p5  ;;  %p642_p13 = por %p641_p12, %p640_p11 }
  0x12   : > { %p623_p7 = pneg %p782_p6 }
  0x14   : > { %p635_p9 = pnand %p633_p8, %p623_p7 }
  0x16   : > { %p636_p10 = pneg %p635_p9 }
  0x18   : > { %p643_p0 = pnand %p642_p13, %p636_p10 }
  0x1a   : > { %646 = shalt.err (!%p643_p0)
}
  0x1b   : > { %s722_s29 = smov 128   ;;  %s723_s30 = smov 8  }
  0x1c   : > { %551 = dma.hbm_to_vmem [thread:$0]  (!%p782_p6), %s849_s1, 256, %s145_s23, [#allocation5], %s722_s29, %s722_s29, %s723_s30  }
  0x1d   : > { %s658_s8 = scalar_lea.vmem %s161_s26, 2048  ;;  %p666_p9 = scmp.lt.s32.totalorder %s161_s26, %s161_s26 }
  0x1e   : > { %p659_p1 = scmp.ne.s32.totalorder %s161_s26, %s658_s8  ;;  %p667_p2 = scmp.lt.s32.totalorder %s658_s8, %s658_s8 }
  0x20   : > { %p661_p5 = pnand %p659_p1, %p623_p7  ;;  %p668_p11 = por %p667_p2, %p666_p9 }
  0x22   : > { %p662_p8 = pneg %p661_p5 }
  0x24   : > { %p669_p10 = pnand %p668_p11, %p662_p8 }
  0x26   : > { %672 = shalt.err (!%p669_p10)
}
  0x27   : > { %s724_s9 = smov 256   ;;  %s725_s10 = smov 16  }
  0x28   : > { %554 = dma.hbm_to_vmem [thread:$0]  (!%p782_p6), %s851_s3, 2048, %s161_s26, [#allocation8], %s724_s9, %s724_s9, %s725_s10  }
  0x29   : > { %179 = sbr.rel (%p773_p3) target bundleno = 439 (0x1b7), region = 36 }
  0x2e   : > { %704 = dma.done.wait (%p555_p4), [#allocation5], 256  }
  0x2f   : > { %706 = vsyncadd (%p555_p4), [#allocation5], 4294967040 }
  0x30   : > { %708 = dma.done.wait (%p555_p4), [#allocation8], 2048  }
  0x31   : > { %710 = vsyncadd (%p555_p4), [#allocation8], 4294965248  ;;  %p856_p2 = scmp.ne.s32.totalorder %s768_s24, 0 }
  0x33   : > { %203 = sbr.rel (%p856_p2) target bundleno = 58 (0x3a), region = 48 }
  0x38   : > { %v204_v0 = vld [vmem:[%s850_s2] sm:$0x1]  ;;  %vm205_vm0 = vcmask 253952  }
  0x39   : > { %206 = vst.msk [vmem:[#allocation9] sm:$0x1] %vm205_vm0, %v204_v0 }
  0x3a PF: > { %v212_v1 = vlaneseq  ;;  %v579_v3 = vld [vmem:[#allocation7 + $0x64] ss:$16 sps:$4 sm:$0xff]   ;;  %v581_v5 = vld [vmem:[#allocation7 + $0x6c] ss:$16 sps:$4 sm:$0xff]   ;;  %v583_v6 = vld [vmem:[#allocation7 + $0x60] ss:$16 sps:$4 sm:$0xff]  }
  0x3b   : > { %v726_v7 = vmov 0   ;;  %352 = vmatprep.subr.bf16.mxu0 %v579_v3  ;;  %v584_v8 = vld [vmem:[#allocation7 + $0x68] ss:$16 sps:$4 sm:$0xff]   ;;  %v585_v9 = vld [vmem:[#allocation7 + $0x44] ss:$16 sps:$4 sm:$0xff]   ;;  %393 = vmatprep.subr.bf16.mxu1 %v581_v5  ;;  %s727_s15 = smov 32  }
  0x3c   : > { %v821_v4 = vshrl.u32 %v212_v1, 7  ;;  %376 = vmatprep.mubr.bf16.mxu0 %v726_v7  ;;  %417 = vmatprep.mubr.bf16.mxu1 %v726_v7  ;;  %v587_v11 = vld [vmem:[#allocation7 + $0x4c] ss:$16 sps:$4 sm:$0xff]   ;;  %v589_v12 = vld [vmem:[#allocation7 + $0x40] ss:$16 sps:$4 sm:$0xff]   ;;  %s208_s16 = sld [smem:[#allocation3 + %s768_s24]] }
  0x3d   : > { %353 = vmatpush1.bf16.msra.mxu0 %v583_v6  ;;  %394 = vmatpush1.bf16.msra.mxu1 %v584_v8  ;;  %v590_v13 = vld [vmem:[#allocation7 + $0x48] ss:$16 sps:$4 sm:$0xff]   ;;  %v591_v15 = vld [vmem:[#allocation7 + $0x24] ss:$16 sps:$4 sm:$0xff]   ;;  %v593_v16 = vld [vmem:[#allocation7 + $0x2c] ss:$16 sps:$4 sm:$0xff]  }
  0x3e   : > { %v214_v10 = vsub.s32 0, %v821_v4  ;;  %354 = vmatprep.subr.bf16.mxu0 %v585_v9  ;;  %395 = vmatprep.subr.bf16.mxu1 %v587_v11  ;;  %v595_v17 = vld [vmem:[#allocation7 + $0x20] ss:$16 sps:$4 sm:$0xff]   ;;  %v596_v18 = vld [vmem:[#allocation7 + $0x28] ss:$16 sps:$4 sm:$0xff]   ;;  %vm219_vm1 = vcmask 261120  }
  0x3f   : > { %v597_v19 = vld [vmem:[#allocation7 + $0x4] ss:$16 sps:$4 sm:$0xff]   ;;  %v599_v20 = vld [vmem:[#allocation7 + $0xc] ss:$16 sps:$4 sm:$0xff]   ;;  %v601_v21 = vld [vmem:[#allocation7] ss:$16 sps:$4 sm:$0xff]  }
  0x40   : > { %v819_v2 = vld [vmem:[#allocation9] sm:$0x1]  ;;  %v602_v22 = vld [vmem:[#allocation7 + $0x8] ss:$16 sps:$4 sm:$0xff]   ;;  %vm340_vm2 = vcmask 523264   ;;  %v326_v29 = vsub.s32 1, %v821_v4 }
  0x41   : > { %v215_v14 = vrot.slane %v819_v2, %v214_v10  ;;  %355 = vmatpush1.bf16.msra.mxu0 %v589_v12  ;;  %396 = vmatpush1.bf16.msra.mxu1 %v590_v13  ;;  %v238_v27 = vld [vmem:[%s852_s4] sm:$0xf]  ;;  %v334_v45 = vsub.s32 3, %v821_v4  ;;  %v330_v46 = vsub.s32 2, %v821_v4  ;;  %s728_s20 = smov [#allocation9]   ;;  %vm445_vm3 = vcmask 253952  }
  0x42   : > { %356 = vmatprep.subr.bf16.mxu0 %v591_v15  ;;  %397 = vmatprep.subr.bf16.mxu1 %v593_v16  ;;  %s209_s17 = scalar_lea.vmem [#allocation4], %s208_s16  ;;  %v323_v28 = vrot.slane %v238_v27, %v214_v10  ;;  %v327_v36 = vrot.slane %v238_v27, %v326_v29  ;;  %s454_s22 = sshll.u32 %s728_s20, 4  ;;  %s455_s22 = int_to_ptr.vmem [resolvable:$true] %s454_s22 }
  0x43   : > { %216 = vrot.lane.b32.xlu0 %v215_v14, %s727_s15  ;;  %v210_v23 = vld [vmem:[%s209_s17] sm:$0x1]  ;;  %v335_v48 = vrot.slane %v238_v27, %v334_v45  ;;  %v331_v49 = vrot.slane %v238_v27, %v330_v46  ;;  %p559_p3 = scmp.eq.s32.totalorder %s768_s24, 7  ;;  %s673_s23 = scalar_lea.vmem %s455_s22, 16 }
  0x44   : > { %p674_p4 = scmp.ne.s32.totalorder %s455_s22, %s673_s23  ;;  %s679_s0 = scalar_lea.vmem %s455_s22, 32 }
  0x45   : > { %357 = vmatpush1.bf16.msra.mxu0 %v595_v17  ;;  %398 = vmatpush1.bf16.msra.mxu1 %v596_v18  ;;  %p680_p12 = scmp.lt.s32.totalorder %s455_s22, %s455_s22  ;;  %p681_p13 = scmp.lt.s32.totalorder %s679_s0, %s673_s23 }
  0x46   : > { %358 = vmatprep.subr.bf16.mxu0 %v597_v19  ;;  %399 = vmatprep.subr.bf16.mxu1 %v599_v20  ;;  %p675_p6 = pnand %p674_p4, %p559_p3 }
  0x47   : > { %p682_p0 = por %p681_p13, %p680_p12 }
  0x48   : > { %p676_p7 = pneg %p675_p6 }
  0x49   : > { %359 = vmatpush1.bf16.msra.mxu0 %v601_v21  ;;  %400 = vmatpush1.bf16.msra.mxu1 %v602_v22 }
  0x4a   : > { %p683_p1 = pnand %p682_p0, %p676_p7 }
  0xb5   : > { %v217_v24 = vpop.permute.xlu0 %216 }
  0xb6   : > { %v220_v25 = vsel %vm219_vm1, %v210_v23, %v217_v24 }
  0xb7   : > { %v221_v26 = vpack.c.bf16 %v220_v25, %v220_v25 }
  0xb9   : > { %528 = vmatmul.mubr.msk.bf16.vlgmr.msra.gmra.mxu0 %vm340_vm2, %v221_v26  ;;  %529 = vmatmul.mubr.msk.bf16.vlgmr.msra.gmra.mxu1 %vm340_vm2, %v221_v26 }
 0x179   : > { %v378_v30 = vpop.f32.mrf.mxu0  ;;  %v419_v31 = vpop.f32.mrf.mxu1 }
 0x17a   : > { %v379_v32 = vadd.f32 %v378_v30, %v323_v28  ;;  %v420_v53 = vadd.f32 %v419_v31, %v331_v49 }
 0x17b   : > { %v380_v33 = vpop.f32.mrf.mxu0  ;;  %v421_v34 = vpop.f32.mrf.mxu1 }
 0x17c   : > { %v530_v35 = vmul.f32 -1.442695, %v379_v32  ;;  %v381_v41 = vadd.f32 %v380_v33, %v327_v36  ;;  %v422_v51 = vadd.f32 %v421_v34, %v335_v48 }
 0x17d   : > { %v382_v37 = vpop.f32.mrf.mxu0  ;;  %v423_v38 = vpop.f32.mrf.mxu1 }
 0x17e   : > { %603 = vpow2.f32 %v530_v35  ;;  %v531_v42 = vmul.f32 -1.442695, %v381_v41 }
 0x17f   : > { %v383_v39 = vpop.f32.mrf.mxu0  ;;  %v424_v40 = vpop.f32.mrf.mxu1 }
 0x180   : > { %605 = vpow2.f32 %v531_v42 }
 0x18b   : > { %v604_v43 = vpop.eup %603 }
 0x18c   : > { %v429_v44 = vadd.f32 1.0, %v604_v43 }
 0x18d   : > { %v606_v47 = vpop.eup %605 }
 0x18e   : > { %607 = vrcp.f32 %v429_v44  ;;  %v435_v50 = vadd.f32 1.0, %v606_v47 }
 0x190   : > { %609 = vrcp.f32 %v435_v50 }
 0x19b   : > { %v608_v52 = vpop.eup %607 }
 0x19c   : > { %v438_v54 = vmul.f32 %v608_v52, %v422_v51 }
 0x19d   : > { %v610_v56 = vpop.eup %609 }
 0x19e   : > { %v439_v55 = vadd.f32 %v438_v54, %v420_v53  ;;  %v441_v57 = vsub.f32 1.0, %v610_v56  ;;  %v443_v60 = vmul.f32 %v610_v56, %v819_v2 }
 0x1a0   : > { %611 = vtanh.f32 %v439_v55 }
 0x1ad   : > { %v612_v58 = vpop.eup %611 }
 0x1ae   : > { %v442_v59 = vmul.f32 %v612_v58, %v441_v57 }
 0x1b0   : > { %v444_v61 = vadd.f32 %v443_v60, %v442_v59 }
 0x1b2   : > { %446 = vst.msk [vmem:[#allocation9] sm:$0x1] %vm445_vm3, %v444_v61 }
 0x1b3   : > { %686 = shalt.err (!%p683_p1)
}
 0x1b4   : > { %545 = dma.vmem_to_hbm [thread:$0]  (%p559_p3), %s455_s22, 16, %s853_s5, [#allocation6]  }
 0x1b5   : > { %712 = dma.done.wait (%p559_p3), [#allocation6], 16  }
 0x1b6   : > { %714 = vsyncadd (%p559_p3), [#allocation6], 4294967280 }
 0x1b7 PF: > { %s22_s21 = sadd.s32 1, %s717_s21  }
 0x1b8   : > { %p19_p5 = scmp.ge.s32.totalorder %s22_s21, 10  }
 0x1ba   :  { %21 = sbr.rel (!%p19_p5) target bundleno = 8 (0x8), region = 74 }
 0x1bf   :  { %467 = vsyncpa [#allocation5], 1 }
 0x1c0   :  { %469 = vsyncpa [#allocation5 + $0x1], 1 }
 0x1c1   :  { %470 = vsyncpa [#allocation8], 1 }
 0x1c2   :  { %471 = vsyncpa [#allocation6], 1 }
 0x1c3   :  { %473 = vsyncpa [#allocation6 + $0x1], 1 }

</bundles_post_ra>
